<compile_context>
chip_gen: v5e
topology: v5e:2x2
jax: 0.10.0
libtpu: 0.0.40
codegen_flags: <defaults>
</compile_context>

<pallas_src>
import math

import jax
import jax.numpy as jnp
from jax.experimental import pallas as pl
from jax.experimental.pallas import tpu as pltpu

_LANE = 128
_LANE_CAP = 4096  # cap on the lane (last) block dim


def _drop_path_kernel(x_ref, scale_ref, o_ref):
    # x_ref/o_ref: (TB, TF) tile of the flattened input/output.
    # scale_ref:   (TB, 1) f32 per-sample scale (0.0 or 1/keep_prob).
    o_ref[...] = (x_ref[...] * scale_ref[...]).astype(o_ref.dtype)


def _budgets():
    """(target_tile_bytes, vmem_limit_bytes) keyed off physical VMEM size."""
    vmem_phys = 128 * 1024 * 1024
    try:
        info = pltpu.get_tpu_info()
        vmem_phys = int(getattr(info, "vmem_capacity_bytes", vmem_phys))
    except Exception:
        pass
    if vmem_phys <= 64 * 1024 * 1024:            # v7x-class: 64 MiB per TC
        return 4 * 1024 * 1024, 48 * 1024 * 1024
    return 2 * 1024 * 1024, 32 * 1024 * 1024     # v5e / v6e


def _choose_tiles(b, f, dtype, target_tile_bytes):
    """Pick (TB, TF): lane-dense last dim first, then sublane-aligned rows."""
    itemsize = jnp.dtype(dtype).itemsize
    sub = max(8, 32 // itemsize)                       # 8 f32 / 16 bf16 / 32 int8
    budget = max(_LANE, target_tile_bytes // itemsize)  # elements per x tile

    if f % _LANE == 0:
        tf = min(f, _LANE_CAP)
        tf -= tf % _LANE
        # Prefer a TF that divides F so every block's stores stay unmasked.
        cand = tf
        while cand >= 4 * _LANE and f % cand:
            cand -= _LANE
        if f % cand == 0:
            tf = cand
    else:
        # TODO(synk): fold g samples per row ((B//g, g*F) view) to make the
        # lane dim a dense multiple of 128 when F itself is ragged/small.
        tf = f                                          # full-dim block is legal

    rows = max(1, budget // tf)
    if b <= rows:
        tb = b                                          # whole batch per tile
    else:
        tb = (rows // sub) * sub                        # dtype-aware sublane align
        tb = max(tb, min(b, sub))                       # never drop below sublane
    return tb, tf


def _apply_scale_impl(x2, scale):
    """out2[i, :] = x2[i, :] * scale[i, 0]   (x2: (B, F), scale: (B, 1) f32)."""
    b, f = x2.shape
    itemsize = jnp.dtype(x2.dtype).itemsize
    target_tile_bytes, vmem_limit = _budgets()
    tb, tf = _choose_tiles(b, f, x2.dtype, target_tile_bytes)

    # Guarantee >=2 blocks along a parallel axis so both v7x TCs get work.
    if pl.cdiv(b, tb) * pl.cdiv(f, tf) == 1 and tf >= 2 * _LANE and tf % (2 * _LANE) == 0:
        tf //= 2

    grid = (pl.cdiv(b, tb), pl.cdiv(f, tf))

    return pl.pallas_call(
        _drop_path_kernel,
        out_shape=jax.ShapeDtypeStruct((b, f), x2.dtype),
        grid=grid,
        in_specs=[
            pl.BlockSpec((tb, tf), lambda i, j: (i, j)),   # x tile
            pl.BlockSpec((tb, 1), lambda i, j: (i, 0)),    # per-sample scale
        ],
        out_specs=pl.BlockSpec((tb, tf), lambda i, j: (i, j)),
        compiler_params=pltpu.CompilerParams(
            dimension_semantics=("parallel", "parallel"),
            vmem_limit_bytes=vmem_limit,
        ),
        cost_estimate=pl.CostEstimate(
            flops=b * f,
            transcendentals=0,
            bytes_accessed=2 * b * f * itemsize + b * 4,
        ),
    )(x2, scale)


@jax.custom_vjp
def _apply_scale(x2, scale):
    return _apply_scale_impl(x2, scale)


def _apply_scale_fwd(x2, scale):
    return _apply_scale_impl(x2, scale), scale


def _apply_scale_bwd(scale, g):
    # d/dx (scale * x) = scale; scale comes from floor() of random bits -> zero grad.
    return _apply_scale_impl(g, scale), jnp.zeros_like(scale)


_apply_scale.defvjp(_apply_scale_fwd, _apply_scale_bwd)


def drop_path(x, p, key, training=True):
    """Pallas DropPath. x: (B, ...). Returns array of same shape/dtype."""
    if p == 0.0 or not training:
        return x
    keep_prob = 1.0 - float(p)
    b = x.shape[0]
    f = int(math.prod(x.shape[1:])) if x.ndim > 1 else 1

    # Per-sample Bernoulli(keep_prob) mask, same derivation as torch:
    # random_tensor = floor(keep_prob + U[0,1)).  Scale kept in f32 (exact
    # 0/ (1/keep_prob)), cast happens once per element inside the kernel.
    u = jax.random.uniform(key, (b,), dtype=jnp.float32)
    mask = jnp.floor(keep_prob + u)
    scale = (mask / keep_prob).reshape(b, 1).astype(jnp.float32)

    # Flatten inner dims so the last block dim is large / lane-dense
    # (e.g. (2, 8, 32) -> (2, 256), a multiple of 128).
    x2 = x.reshape(b, f)
    out2 = _apply_scale(x2, scale)
    return out2.reshape(x.shape)


class DropPath:
    """Mirror of the PyTorch DropPath module (no parameters)."""

    def __init__(self, p, **kwargs):
        self.p = p
        self.training = True

    def __call__(self, x, key):
        return drop_path(x, self.p, key, self.training)


if __name__ == "__main__":
    key = jax.random.PRNGKey(0)
    kx, km = jax.random.split(key)

    B, N, D = 2, 8, 32
    x = jax.random.normal(kx, (B, N, D), dtype=jnp.float32)

    mod = DropPath(p=0.3)

    # training mode: per-sample keep/drop with 1/keep_prob rescale
    out = jax.block_until_ready(mod(x, km))
    assert out.shape == x.shape and out.dtype == x.dtype

    # reference check (pure JAX), same mask derivation
    keep_prob = 1.0 - mod.p
    u = jax.random.uniform(km, (B,), dtype=jnp.float32)
    mask_ref = jnp.floor(keep_prob + u)
    ref = x / keep_prob * mask_ref[:, None, None]
    assert jnp.allclose(out, ref, rtol=1e-5, atol=1e-6)

    # backward: custom_vjp routes the cotangent through the same kernel
    g = jax.grad(lambda v: jnp.sum(drop_path(v, mod.p, km, True)))(x)
    g = jax.block_until_ready(g)
    g_ref = jnp.broadcast_to((mask_ref / keep_prob)[:, None, None], x.shape)
    assert jnp.allclose(g, g_ref, rtol=1e-5, atol=1e-6)

    # eval mode: identity
    mod.training = False
    out_eval = jax.block_until_ready(mod(x, km))
    assert jnp.array_equal(out_eval, x)

    print("KERNEL_OK")
</pallas_src>

<mosaic_0001>
module attributes {stable_mosaic.version = 11 : i64} {
  func.func @_drop_path_kernel(%arg0: i32, %arg1: i32, %arg2: memref<2x128xf32, #tpu.memory_space<vmem>>, %arg3: memref<2x1xf32, #tpu.memory_space<vmem>>, %arg4: memref<2x128xf32, #tpu.memory_space<vmem>>) attributes {dimension_semantics = [#tpu.dimension_semantics<parallel>, #tpu.dimension_semantics<parallel>], iteration_bounds = array<i64: 1, 2>, scalar_prefetch = 0 : i64, scratch_operands = 0 : i64, tpu.core_type = #tpu.core_type<tc>, window_params = [{transform_indices = @transform_0, window_bounds = array<i64: 2, 128>}, {transform_indices = @transform_1, window_bounds = array<i64: 2, 1>}, {transform_indices = @transform_2, window_bounds = array<i64: 2, 128>}]} {
    %c0 = arith.constant 0 : index
    %c0_0 = arith.constant 0 : index
    %0 = vector.load %arg2[%c0, %c0_0] : memref<2x128xf32, #tpu.memory_space<vmem>>, vector<2x128xf32>
    %c0_1 = arith.constant 0 : index
    %c0_2 = arith.constant 0 : index
    %1 = vector.load %arg3[%c0_1, %c0_2] : memref<2x1xf32, #tpu.memory_space<vmem>>, vector<2x1xf32>
    %2 = vector.broadcast %1 : vector<2x1xf32> to vector<2x128xf32>
    %3 = arith.mulf %0, %2 : vector<2x128xf32>
    %c0_3 = arith.constant 0 : index
    %c0_4 = arith.constant 0 : index
    %4 = vector.load %arg4[%c0_3, %c0_4] : memref<2x128xf32, #tpu.memory_space<vmem>>, vector<2x128xf32>
    tpu.vector_store %arg4[%c0_3, %c0_4], %3 {strides = array<i32>} : memref<2x128xf32, #tpu.memory_space<vmem>>, vector<2x128xf32>,
    return
  }
  func.func @transform_0(%arg0: i32, %arg1: i32) -> (i32, i32) {
    %c0_i32 = arith.constant 0 : i32
    return %arg0, %arg1 : i32, i32
  }
  func.func @transform_1(%arg0: i32, %arg1: i32) -> (i32, i32) {
    %c0_i32 = arith.constant 0 : i32
    %c0_i32_0 = arith.constant 0 : i32
    return %arg0, %c0_i32 : i32, i32
  }
  func.func @transform_2(%arg0: i32, %arg1: i32) -> (i32, i32) {
    %c0_i32 = arith.constant 0 : i32
    return %arg0, %arg1 : i32, i32
  }
}

</mosaic_0001>

<bundles_post_ra>
// kernel: tpu_custom_call.1
= control target key start
LH: loop header
LB: loop body
LE: loop exit
PB: predicated region body
PF: predicated region fallthrough
CT: control target
= control target key end

     0   :  { %7 = vsyncpa [#allocation3], 0  ;;  %s651_s0 = inlined_call_operand.hbm [shape: f32[2,256], index: 0, kind: input, shape index: {}]   ;;  %s652_s1 = inlined_call_operand.vmem [shape: f32[2,1], index: 1, kind: input, shape index: {}]   ;;  %s653_s2 = inlined_call_operand.hbm [shape: f32[2,256], index: 2, kind: output, shape index: {}]  }
   0x1   :  { %9 = vsyncpa [#allocation3 + $0x1], 0 }
   0x2   :  { %10 = vsyncpa [#allocation4], 0 }
   0x3   :  { %12 = vsyncpa [#allocation4 + $0x1], 0  ;;  %s528_s9 = smov 0   ;;  %s530_s10 = smov 0  }
   0x4   :  { %s532_s11 = smov 0   ;;  %s534_s12 = smov 0  }
   0x5   :  { %s536_s13 = smov 0   ;;  %s538_s14 = smov 0  }
   0x6 LB: > { %s320_s15 = sadd.s32 4294967295, %s510_s14   ;;  %s321_s16 = sadd.s32 4294967294, %s510_s14   ;;  %s510_s14 = sphi %s538_s14, %s18_s14   ;;  %s506_s13 = sphi %s536_s13, %s662_s13   ;;  %s502_s12 = sphi %s534_s12, %s661_s12   ;;  %s498_s11 = sphi %s532_s11, %s660_s11   ;;  %s494_s10 = sphi %s530_s10, %s659_s10   ;;  %s490_s9 = sphi %s528_s9, %s658_s9  }
   0x7   : > { %s27_s17 = sadd.s32 1, %s506_s13  ;;  %s39_s18 = sadd.s32 1, %s498_s11 }
   0x8   : > { %p28_p0 = scmp.ge.s32.totalorder %s27_s17, 2  ;;  %p46_p1 = scmp.ne.s32.totalorder %s498_s11, %s494_s10 }
   0x9   : > { %p47_p2 = scmp.eq.s32.totalorder %s510_s14, 0  ;;  %p52_p3 = scmp.ne.s32.totalorder %s494_s10, %s490_s9 }
   0xa   : > { %s664_s17 = smov (%p28_p0, %s27_s17), 0  ;;  %p53_p5 = scmp.eq.s32.totalorder %s320_s15, 0 }
   0xb   : > { %p569_p4 = por %p47_p2, %p46_p1  ;;  %s35_s20 = ssub.s32 %s506_s13, %s664_s17 }
   0xc   : > { %p104_p6 = scmp.eq.s32.totalorder %s320_s15, 1  ;;  %p37_p7 = scmp.eq.s32.totalorder %s35_s20, 0 }
   0xd   : > { %p575_p8 = por %p53_p5, %p52_p3  ;;  %p110_p10 = scmp.eq.s32.totalorder %s321_s16, 1 }
   0xe   : > { %p579_p9 = por %p104_p6, %p46_p1  ;;  %p324_p12 = scmp.ge.s32.totalorder %s510_s14, 2 }
   0xf   : > { %s584_s23 = scalar_select %p37_p7, %s498_s11, %s39_s18  }
  0x10   : > { %p586_p11 = por %p110_p10, %p52_p3  ;;  %p346_p13 = scmp.lt.s32.totalorder %s510_s14, 2 }
  0x11   : > { %s137_s25 = sand.u32 1, %s498_s11   ;;  %s326_s27 = sshll.u32 %s506_s13, 1 }
  0x12   : > { %s325_s26 = sshll.u32 %s137_s25, 1  ;;  %s147_s30 = scalar_lea.hbm %s651_s0, %s326_s27 }
  0x13   : > { %s141_s3 = scalar_lea.vmem [#allocation2], %s325_s26  ;;  %s149_s5 = sshll.u32 %s147_s30, 4  ;;  %s150_s5 = int_to_ptr.hbm [resolvable:$true] %s149_s5 }
  0x14   : > { %s151_s4 = sshll.u32 %s141_s3, 4  ;;  %p339_p0 = pnand %p346_p13, %p569_p4  ;;  %s152_s4 = int_to_ptr.vmem [resolvable:$true] %s151_s4 }
  0x15   : > { %p327_p1 = scmp.ge.s32.totalorder %s510_s14, 1  ;;  %p156_p2 = scmp.lt.s32.totalorder %s510_s14, 3 }
  0x16   : > { %s138_s6 = scalar_lea.sflag [#allocation3], %s137_s25 }
  0x17   : > { %341 = dma.hbm_to_vmem [thread:$0]  (!%p339_p0), %s150_s5, 32, %s152_s4, %s138_s6  }
  0x18   : > { %p157_p3 = pnand %p327_p1, %p156_p2 }
  0x19   : > { %s602_s7 = sand.u32 (!%p157_p3), 1, %s494_s10  }
  0x1a   : > { %160 = sbr.rel (%p157_p3) target bundleno = 154 (0x9a), region = 28  ;;  %s328_s8 = sshll.u32 (!%p157_p3), %s602_s7, 1 }
  0x1b   : > { %s163_s15 = scalar_lea.sflag (!%p157_p3), [#allocation3], %s602_s7  ;;  %s166_s16 = scalar_lea.vmem (!%p157_p3), [#allocation2], %s328_s8 }
  0x1f   : > { %481 = dma.done.wait (%p575_p8), %s163_s15, 32  }
  0x20   : > { %483 = vsyncadd (%p575_p8), %s163_s15, 4294967264  ;;  %v512_v0 = vmov 0   ;;  %v197_v1 = vld [vmem:[%s652_s1] sm:$0x3]  ;;  %s331_s20 = sshll.u32 %s502_s12, 1  ;;  %s191_s28 = scalar_lea.vmem [#allocation5], %s328_s8 }
  0x21   : > { %397 = vset.pattern.permute.xlu0 %v512_v0  ;;  %s218_s27 = scalar_lea.hbm %s653_s2, %s331_s20  ;;  %v196_v2 = vld [vmem:[%s166_s16] sm:$0x3]  ;;  %s220_s29 = sshll.u32 %s191_s28, 4  ;;  %s221_s29 = int_to_ptr.vmem [resolvable:$true] %s220_s29 }
  0x22   : > { %200 = vperm.xlu0 %397, %v197_v1   ;;  %s222_s21 = sshll.u32 %s218_s27, 4  ;;  %s206_s30 = scalar_lea.sflag [#allocation4], %s602_s7  ;;  %s223_s21 = int_to_ptr.hbm [resolvable:$true] %s222_s21 }
  0x23   : > { %s442_s3 = sshra.s32 %s223_s21, 4  ;;  %s448_s6 = scalar_lea.hbm %s653_s2, 4  ;;  %s443_s3 = int_to_ptr.hbm [resolvable:$true] %s442_s3 }
  0x24   : > { %s444_s4 = scalar_lea.hbm %s443_s3, 2  ;;  %p449_p7 = scmp.lt.s32.totalorder %s443_s3, %s653_s2 }
  0x25   : > { %p445_p4 = scmp.ne.s32.totalorder %s443_s3, %s444_s4  ;;  %p450_p8 = scmp.lt.s32.totalorder %s448_s6, %s444_s4 }
  0x27   : > { %p446_p5 = pnand %p445_p4, %p579_p9  ;;  %p451_p10 = por %p450_p8, %p449_p7 }
  0x29   : > { %p447_p6 = pneg %p446_p5 }
  0x2b   : > { %p452_p13 = pnand %p451_p10, %p447_p6 }
  0x94   : > { %v201_v3 = vpop.permute.xlu0 %200 }
  0x95   : > { %v203_v4 = vmul.f32 %v201_v3, %v196_v2 }
  0x97   : > { %204 = vst [vmem:[%s191_s28] sm:$0x3] %v203_v4 }
  0x98   : > { %455 = shalt.err (!%p452_p13)
}
  0x99   : > { %336 = dma.vmem_to_hbm [thread:$0]  (%p579_p9), %s221_s29, 32, %s223_s21, %s206_s30  }
  0x9a PF: > { %s234_s7 = sand.u32 1, %s490_s9   ;;  %p343_p0 = pnand %p324_p12, %p586_p11 }
  0x9b   : > { %s235_s16 = scalar_lea.sflag [#allocation4], %s234_s7 }
  0x9c   : > { %p344_p1 = pneg %p343_p0 }
  0x9e   : > { %485 = dma.done.wait (%p344_p1), %s235_s16, 32  }
  0x9f   : > { %487 = vsyncadd (%p344_p1), %s235_s16, 4294967264  ;;  %s18_s14 = sadd.s32 1, %s510_s14   ;;  %s658_s9 = smov %s494_s10 }
  0xa0   : > { %p15_p2 = scmp.ge.s32.totalorder %s18_s14, 4   ;;  %s659_s10 = smov %s498_s11 }
  0xa1   : > { %s660_s11 = smov %s584_s23  ;;  %s661_s12 = smov %s506_s13 }
  0xa2   : > { %s662_s13 = smov %s664_s17  ;;  %17 = sbr.rel (!%p15_p2) target bundleno = 6 (0x6), region = 76 }
  0xa7   :  { %241 = vsyncpa [#allocation3], 1 }
  0xa8   :  { %243 = vsyncpa [#allocation3 + $0x1], 1 }
  0xa9   :  { %244 = vsyncpa [#allocation4], 1 }
  0xaa   :  { %246 = vsyncpa [#allocation4 + $0x1], 1 }

</bundles_post_ra>
